<compile_context>
chip_gen: v5e
topology: v5e:2x2
jax: 0.10.0
libtpu: 0.0.40
codegen_flags: <defaults>
</compile_context>

<pallas_src>
import jax
import jax.numpy as jnp
from jax.experimental import pallas as pl
from jax.experimental.pallas import tpu as pltpu


def _round_up(n, m):
    return ((n + m - 1) // m) * m


def _proj_head_kernel(x_ref, w1_ref, b1_ref, w2_ref, b2_ref, o_ref):
    # Cast the f32 activation tile to bf16 in-kernel (VPU; hides under DMA/MXU slack).
    x_bf = x_ref[...].astype(jnp.bfloat16)
    # First linear: bf16 x bf16 -> f32 accumulate on the MXU.
    h = jnp.dot(x_bf, w1_ref[...], preferred_element_type=jnp.float32)
    # Bias + ReLU in f32 on the VPU (v5e VPU has no bf16 anyway).
    h = jnp.maximum(h + b1_ref[...], 0.0)
    # Second linear: cast activations to bf16 for the MXU, accumulate in f32.
    o = jnp.dot(h.astype(jnp.bfloat16), w2_ref[...], preferred_element_type=jnp.float32)
    o_ref[...] = (o + b2_ref[...]).astype(o_ref.dtype)


def _projection_head_call(x, w1_bf, b1_2d, w2_bf, b2_2d, *, block_b, out_dtype):
    B, in_dim = x.shape
    hid = w1_bf.shape[1]
    out_dim = w2_bf.shape[1]

    # Batch tile: multiple of 16, capped at ~B/2 so the parallel grid axis has >= 2 steps
    # whenever the batch is big enough (shards across both TensorCores on v7x).
    half_b = _round_up(pl.cdiv(B, 2), 16)
    block_b_eff = max(16, min(_round_up(block_b, 16), half_b))
    grid = (pl.cdiv(B, block_b_eff),)  # ragged last block handled by Pallas (masked writes)

    flops = 2 * B * (in_dim * hid + hid * out_dim)
    bytes_accessed = (
        B * in_dim * x.dtype.itemsize          # x read (f32)
        + in_dim * hid * 2 + hid * out_dim * 2  # bf16 weights
        + (hid + out_dim) * 4                   # f32 biases
        + B * out_dim * jnp.dtype(out_dtype).itemsize  # output write
    )

    return pl.pallas_call(
        _proj_head_kernel,
        out_shape=jax.ShapeDtypeStruct((B, out_dim), out_dtype),
        grid_spec=pltpu.PrefetchScalarGridSpec(
            num_scalar_prefetch=0,
            grid=grid,
            in_specs=[
                pl.BlockSpec((block_b_eff, in_dim), lambda i: (i, 0)),  # x tile (f32)
                pl.BlockSpec((in_dim, hid), lambda i: (0, 0)),          # W1 (resident)
                pl.BlockSpec((1, hid), lambda i: (0, 0)),               # b1
                pl.BlockSpec((hid, out_dim), lambda i: (0, 0)),         # W2 (resident)
                pl.BlockSpec((1, out_dim), lambda i: (0, 0)),           # b2
            ],
            out_specs=pl.BlockSpec((block_b_eff, out_dim), lambda i: (i, 0)),
        ),
        compiler_params=pltpu.CompilerParams(
            dimension_semantics=("parallel",),
        ),
        cost_estimate=pl.CostEstimate(
            flops=flops, transcendentals=0, bytes_accessed=bytes_accessed),
    )(x, w1_bf, b1_2d, w2_bf, b2_2d)


def make_projection_head(w1, b1, w2, b2, *, block_b=512, out_dtype=jnp.float32):
    """Convert parameters once (bf16 weights, f32 biases) and return a jitted forward fn.

    block_b: batch tile size. 512-1024 is near the HBM roofline on v6e/v7x; 256-512 on
    v5e. The effective tile is also capped so the grid has >= 2 parallel steps (v7x).
    """
    w1_bf = jnp.asarray(w1, jnp.bfloat16)
    w2_bf = jnp.asarray(w2, jnp.bfloat16)
    b1_2d = jnp.asarray(b1, jnp.float32).reshape(1, -1)
    b2_2d = jnp.asarray(b2, jnp.float32).reshape(1, -1)

    def fwd(x):
        return _projection_head_call(x, w1_bf, b1_2d, w2_bf, b2_2d,
                                     block_b=block_b, out_dtype=out_dtype)

    return jax.jit(fwd)


def projection_head_forward(x, w1, b1, w2, b2, *, block_b=512, out_dtype=jnp.float32):
    """One-off convenience wrapper (params converted per call; prefer make_projection_head)."""
    return _projection_head_call(
        x,
        jnp.asarray(w1, jnp.bfloat16),
        jnp.asarray(b1, jnp.float32).reshape(1, -1),
        jnp.asarray(w2, jnp.bfloat16),
        jnp.asarray(b2, jnp.float32).reshape(1, -1),
        block_b=block_b, out_dtype=out_dtype)


def _init_params(key, input_dim=512, hidden_dim=256, projection_dim=128):
    # Deterministic synthetic init (uniform, roughly matching PyTorch Linear scale).
    k1, k2, k3, k4 = jax.random.split(key, 4)
    lim1 = 1.0 / jnp.sqrt(input_dim)
    lim2 = 1.0 / jnp.sqrt(hidden_dim)
    w1 = jax.random.uniform(k1, (input_dim, hidden_dim), jnp.float32, -lim1, lim1)
    b1 = jax.random.uniform(k2, (hidden_dim,), jnp.float32, -lim1, lim1)
    w2 = jax.random.uniform(k3, (hidden_dim, projection_dim), jnp.float32, -lim2, lim2)
    b2 = jax.random.uniform(k4, (projection_dim,), jnp.float32, -lim2, lim2)
    return w1, b1, w2, b2


if __name__ == "__main__":
    key = jax.random.PRNGKey(0)
    kx, kp = jax.random.split(key)

    B, INPUT_DIM, HIDDEN_DIM, PROJ_DIM = 16, 512, 256, 128
    x = jax.random.normal(kx, (B, INPUT_DIM), jnp.float32)
    w1, b1, w2, b2 = _init_params(kp, INPUT_DIM, HIDDEN_DIM, PROJ_DIM)

    proj = make_projection_head(w1, b1, w2, b2, block_b=512)
    out = jax.block_until_ready(proj(x))
    assert out.shape == (B, PROJ_DIM)
    assert out.dtype == jnp.float32

    # Reference 1: bf16-emulating reference (same numerics as the kernel).
    xb, w1b, w2b = (t.astype(jnp.bfloat16) for t in (x, w1, w2))
    h_ref = jnp.maximum(jnp.dot(xb, w1b, preferred_element_type=jnp.float32) + b1, 0.0)
    ref_bf16 = jnp.dot(h_ref.astype(jnp.bfloat16), w2b,
                       preferred_element_type=jnp.float32) + b2
    assert jnp.allclose(out, ref_bf16, atol=1e-2, rtol=1e-2)

    # Reference 2: original f32 module semantics (loose tolerance for bf16 MXU inputs).
    ref_f32 = jnp.maximum(x @ w1 + b1, 0.0) @ w2 + b2
    assert jnp.allclose(out, ref_f32, atol=1e-1, rtol=1e-1)

    # Also exercise a ragged batch (no padding path) through the one-off wrapper.
    x_ragged = jax.random.normal(kx, (19, INPUT_DIM), jnp.float32)
    out_ragged = jax.block_until_ready(
        projection_head_forward(x_ragged, w1, b1, w2, b2, block_b=512))
    ref_ragged = jnp.maximum(x_ragged @ w1 + b1, 0.0) @ w2 + b2
    assert out_ragged.shape == (19, PROJ_DIM)
    assert jnp.allclose(out_ragged, ref_ragged, atol=1e-1, rtol=1e-1)

    print("KERNEL_OK")
</pallas_src>

<mosaic_0001>
module attributes {stable_mosaic.version = 11 : i64} {
  func.func @_proj_head_kernel(%arg0: i32, %arg1: memref<16x512xf32, #tpu.memory_space<vmem>>, %arg2: memref<512x256xbf16, #tpu.memory_space<vmem>>, %arg3: memref<1x256xf32, #tpu.memory_space<vmem>>, %arg4: memref<256x128xbf16, #tpu.memory_space<vmem>>, %arg5: memref<1x128xf32, #tpu.memory_space<vmem>>, %arg6: memref<16x128xf32, #tpu.memory_space<vmem>>) attributes {dimension_semantics = [#tpu.dimension_semantics<parallel>], iteration_bounds = array<i64: 1>, scalar_prefetch = 0 : i64, scratch_operands = 0 : i64, tpu.core_type = #tpu.core_type<tc>, window_params = [{transform_indices = @transform_0, window_bounds = array<i64: 16, 512>}, {pipeline_mode = #tpu.pipeline_mode<synchronous>, transform_indices = @transform_1, window_bounds = array<i64: 512, 256>}, {pipeline_mode = #tpu.pipeline_mode<synchronous>, transform_indices = @transform_2, window_bounds = array<i64: 1, 256>}, {pipeline_mode = #tpu.pipeline_mode<synchronous>, transform_indices = @transform_3, window_bounds = array<i64: 256, 128>}, {pipeline_mode = #tpu.pipeline_mode<synchronous>, transform_indices = @transform_4, window_bounds = array<i64: 1, 128>}, {transform_indices = @transform_5, window_bounds = array<i64: 16, 128>}]} {
    %c0 = arith.constant 0 : index
    %c0_0 = arith.constant 0 : index
    %0 = vector.load %arg1[%c0, %c0_0] : memref<16x512xf32, #tpu.memory_space<vmem>>, vector<16x512xf32>
    %1 = arith.truncf %0 : vector<16x512xf32> to vector<16x512xbf16>
    %c0_1 = arith.constant 0 : index
    %c0_2 = arith.constant 0 : index
    %2 = vector.load %arg2[%c0_1, %c0_2] : memref<512x256xbf16, #tpu.memory_space<vmem>>, vector<512x256xbf16>
    %cst = arith.constant dense<0.000000e+00> : vector<16x256xf32>
    %3 = tpu.matmul %1, %2, %cst {dimension_numbers = #tpu.dot_dimension_numbers<[1], [0], [0], [1], [0, 0, 1, 1], [], []>} : vector<16x512xbf16>, vector<512x256xbf16>, vector<16x256xf32> -> vector<16x256xf32>
    %c0_3 = arith.constant 0 : index
    %c0_4 = arith.constant 0 : index
    %4 = vector.load %arg3[%c0_3, %c0_4] : memref<1x256xf32, #tpu.memory_space<vmem>>, vector<1x256xf32>
    %5 = vector.broadcast %4 : vector<1x256xf32> to vector<16x256xf32>
    %6 = arith.addf %3, %5 : vector<16x256xf32>
    %cst_5 = arith.constant 0.000000e+00 : f32
    %7 = vector.broadcast %cst_5 : f32 to vector<16x256xf32>
    %8 = arith.maximumf %6, %7 : vector<16x256xf32>
    %9 = arith.truncf %8 : vector<16x256xf32> to vector<16x256xbf16>
    %c0_6 = arith.constant 0 : index
    %c0_7 = arith.constant 0 : index
    %10 = vector.load %arg4[%c0_6, %c0_7] : memref<256x128xbf16, #tpu.memory_space<vmem>>, vector<256x128xbf16>
    %cst_8 = arith.constant dense<0.000000e+00> : vector<16x128xf32>
    %11 = tpu.matmul %9, %10, %cst_8 {dimension_numbers = #tpu.dot_dimension_numbers<[1], [0], [0], [1], [0, 0, 1, 1], [], []>} : vector<16x256xbf16>, vector<256x128xbf16>, vector<16x128xf32> -> vector<16x128xf32>
    %c0_9 = arith.constant 0 : index
    %c0_10 = arith.constant 0 : index
    %12 = vector.load %arg5[%c0_9, %c0_10] : memref<1x128xf32, #tpu.memory_space<vmem>>, vector<1x128xf32>
    %13 = vector.broadcast %12 : vector<1x128xf32> to vector<16x128xf32>
    %14 = arith.addf %11, %13 : vector<16x128xf32>
    %c0_11 = arith.constant 0 : index
    %c0_12 = arith.constant 0 : index
    %15 = vector.load %arg6[%c0_11, %c0_12] : memref<16x128xf32, #tpu.memory_space<vmem>>, vector<16x128xf32>
    tpu.vector_store %arg6[%c0_11, %c0_12], %14 {strides = array<i32>} : memref<16x128xf32, #tpu.memory_space<vmem>>, vector<16x128xf32>,
    return
  }
  func.func @transform_0(%arg0: i32) -> (i32, i32) {
    %c0_i32 = arith.constant 0 : i32
    %c0_i32_0 = arith.constant 0 : i32
    return %arg0, %c0_i32 : i32, i32
  }
  func.func @transform_1(%arg0: i32) -> (i32, i32) {
    %c0_i32 = arith.constant 0 : i32
    %c0_i32_0 = arith.constant 0 : i32
    %c0_i32_1 = arith.constant 0 : i32
    return %c0_i32, %c0_i32_0 : i32, i32
  }
  func.func @transform_2(%arg0: i32) -> (i32, i32) {
    %c0_i32 = arith.constant 0 : i32
    %c0_i32_0 = arith.constant 0 : i32
    %c0_i32_1 = arith.constant 0 : i32
    return %c0_i32, %c0_i32_0 : i32, i32
  }
  func.func @transform_3(%arg0: i32) -> (i32, i32) {
    %c0_i32 = arith.constant 0 : i32
    %c0_i32_0 = arith.constant 0 : i32
    %c0_i32_1 = arith.constant 0 : i32
    return %c0_i32, %c0_i32_0 : i32, i32
  }
  func.func @transform_4(%arg0: i32) -> (i32, i32) {
    %c0_i32 = arith.constant 0 : i32
    %c0_i32_0 = arith.constant 0 : i32
    %c0_i32_1 = arith.constant 0 : i32
    return %c0_i32, %c0_i32_0 : i32, i32
  }
  func.func @transform_5(%arg0: i32) -> (i32, i32) {
    %c0_i32 = arith.constant 0 : i32
    %c0_i32_0 = arith.constant 0 : i32
    return %arg0, %c0_i32 : i32, i32
  }
}

</mosaic_0001>

<bundles_post_ra>
// kernel: fwd.1
= control target key start
LH: loop header
LB: loop body
LE: loop exit
PB: predicated region body
PF: predicated region fallthrough
CT: control target
= control target key end

     0   :  { %10 = vsyncpa [#allocation3], 0  ;;  %s1406_s0 = inlined_call_operand.hbm [shape: f32[16,512], index: 0, kind: input, shape index: {}]   ;;  %s1407_s1 = inlined_call_operand.hbm [shape: bf16[512,256], index: 1, kind: input, shape index: {}]   ;;  %s1408_s2 = inlined_call_operand.hbm [shape: f32[1,256], index: 2, kind: input, shape index: {}]   ;;  %s1409_s3 = inlined_call_operand.hbm [shape: bf16[256,128], index: 3, kind: input, shape index: {}]   ;;  %s1410_s4 = inlined_call_operand.vmem [shape: f32[1,128], index: 4, kind: input, shape index: {}]   ;;  %s1411_s5 = inlined_call_operand.hbm [shape: f32[16,128], index: 5, kind: output, shape index: {}]  }
   0x1   :  { %11 = vsyncpa [#allocation6], 0 }
   0x2   :  { %12 = vsyncpa [#allocation9], 0  ;;  %s31_s20 = sshll.u32 %s1407_s1, 4  ;;  %s32_s20 = int_to_ptr.hbm [resolvable:$true] %s31_s20 }
   0x3   :  { %13 = vsyncpa [#allocation4], 0  ;;  %s1325_s21 = smov [#allocation5]   ;;  %s18_s25 = sshll.u32 %s1406_s0, 4  ;;  %s19_s25 = int_to_ptr.hbm [resolvable:$true] %s18_s25 }
   0x4   :  { %s33_s22 = sshll.u32 %s1325_s21, 4  ;;  %s1326_s26 = smov 128   ;;  %s34_s22 = int_to_ptr.vmem [resolvable:$true] %s33_s22 }
   0x5   :  { %s1327_s27 = smov 8   ;;  %s1328_s28 = smov [#allocation2]  }
   0x6   :  { %39 = dma.hbm_to_vmem [thread:$0]  %s32_s20, 8192, %s34_s22, [#allocation6], %s1326_s26, %s1326_s26, %s1327_s27  }
   0x7   :  { %s20_s29 = sshll.u32 %s1328_s28, 4  ;;  %s1329_s1 = smov 512   ;;  %s21_s29 = int_to_ptr.vmem [resolvable:$true] %s20_s29 }
   0x8   :  { %s1330_s30 = smov 32   ;;  %s45_s8 = sshll.u32 %s1408_s2, 4  ;;  %s46_s8 = int_to_ptr.hbm [resolvable:$true] %s45_s8 }
   0x9   :  { %26 = dma.hbm_to_vmem [thread:$0]  %s19_s25, 1024, %s21_s29, [#allocation3], %s1329_s1, %s1329_s1, %s1330_s30  }
   0xa   :  { %s1331_s9 = smov [#allocation7]   ;;  %s55_s12 = sshll.u32 %s1409_s3, 4  ;;  %s56_s12 = int_to_ptr.hbm [resolvable:$true] %s55_s12 }
   0xb   :  { %s47_s0 = sshll.u32 %s1331_s9, 4  ;;  %s1332_s13 = smov [#allocation8]   ;;  %s48_s0 = int_to_ptr.vmem [resolvable:$true] %s47_s0 }
   0xc   :  { %50 = dma.hbm_to_vmem [thread:$0]  %s46_s8, 32, %s48_s0, [#allocation6]  }
   0xd   :  { %s57_s14 = sshll.u32 %s1332_s13, 4  ;;  %s1333_s15 = smov 64   ;;  %s58_s14 = int_to_ptr.vmem [resolvable:$true] %s57_s14 }
   0xe   :  { %s1334_s16 = smov 4  }
   0xf   :  { %63 = dma.hbm_to_vmem [thread:$0]  %s56_s12, 2048, %s58_s14, [#allocation9], %s1333_s15, %s1333_s15, %s1334_s16  }
  0x10   :  { %1317 = dma.done.wait [#allocation3], 1024  }
  0x11   :  { %1318 = vsyncadd [#allocation3], 4294966272 }
  0x12   :  { %1319 = dma.done.wait [#allocation6], 8224  }
  0x13   :  { %1320 = vsyncadd [#allocation6], 4294959072 }
  0x14   :  { %1321 = dma.done.wait [#allocation9], 2048  }
  0x15   :  { %1322 = vsyncadd [#allocation9], 4294965248  ;;  %v843_v0 = vld [vmem:[#allocation5 + $0x70] sm:$0xf]  ;;  %v1120_v1 = vld [vmem:[#allocation5 + $0x74] sm:$0xf0] }
  0x16   :  { %v907_v2 = vld [vmem:[#allocation5 + $0xf0] sm:$0xf]  ;;  %v844_v3 = vor.u32 %v1120_v1, %v843_v0  ;;  %v1136_v4 = vld [vmem:[#allocation5 + $0xf4] sm:$0xf0]  ;;  %v835_v11 = vld [vmem:[#allocation5 + $0x60] sm:$0xf] }
  0x17   :  { %v971_v5 = vld [vmem:[#allocation5 + $0x170] sm:$0xf]  ;;  %v1152_v6 = vld [vmem:[#allocation5 + $0x174] sm:$0xf0]  ;;  %v908_v7 = vor.u32 %v1136_v4, %v907_v2  ;;  %v1118_v13 = vld [vmem:[#allocation5 + $0x64] sm:$0xf0] }
  0x18   :  { %v972_v8 = vor.u32 %v1152_v6, %v971_v5  ;;  %v1035_v9 = vld [vmem:[#allocation5 + $0x1f0] sm:$0xf]  ;;  %v1168_v10 = vld [vmem:[#allocation5 + $0x1f4] sm:$0xf0]  ;;  %484 = vmatpush.bf16.msra.mxu0 %v844_v3  ;;  %v899_v14 = vld [vmem:[#allocation5 + $0xe0] sm:$0xf]  ;;  %v836_v16 = vor.u32 %v1118_v13, %v835_v11 }
  0x19   :  { %v1036_v12 = vor.u32 %v1168_v10, %v1035_v9  ;;  %v1134_v15 = vld [vmem:[#allocation5 + $0xe4] sm:$0xf0]  ;;  %498 = vmatpush.bf16.msra.mxu1 %v908_v7  ;;  %v963_v18 = vld [vmem:[#allocation5 + $0x160] sm:$0xf]  ;;  %v827_v23 = vld [vmem:[#allocation5 + $0x50] sm:$0xf] }
  0x1a   :  { %512 = vmatpush.bf16.msra.mxu2 %v972_v8  ;;  %v900_v17 = vor.u32 %v1134_v15, %v899_v14  ;;  %v1150_v19 = vld [vmem:[#allocation5 + $0x164] sm:$0xf0]  ;;  %v1027_v20 = vld [vmem:[#allocation5 + $0x1e0] sm:$0xf]  ;;  %v1116_v24 = vld [vmem:[#allocation5 + $0x54] sm:$0xf0] }
  0x1b   :  { %526 = vmatpush.bf16.msra.mxu3 %v1036_v12  ;;  %v964_v21 = vor.u32 %v1150_v19, %v963_v18  ;;  %v1166_v22 = vld [vmem:[#allocation5 + $0x1e4] sm:$0xf0]  ;;  %v891_v26 = vld [vmem:[#allocation5 + $0xd0] sm:$0xf]  ;;  %v1132_v27 = vld [vmem:[#allocation5 + $0xd4] sm:$0xf0]  ;;  %v828_v29 = vor.u32 %v1116_v24, %v827_v23 }
  0x1c   :  { %v1028_v25 = vor.u32 %v1166_v22, %v1027_v20  ;;  %v955_v28 = vld [vmem:[#allocation5 + $0x150] sm:$0xf]  ;;  %485 = vmatpush.bf16.msra.mxu0 %v836_v16  ;;  %v1148_v30 = vld [vmem:[#allocation5 + $0x154] sm:$0xf0]  ;;  %v892_v33 = vor.u32 %v1132_v27, %v891_v26  ;;  %v819_v35 = vld [vmem:[#allocation5 + $0x40] sm:$0xf] }
  0x1d   :  { %v1019_v31 = vld [vmem:[#allocation5 + $0x1d0] sm:$0xf]  ;;  %v1164_v32 = vld [vmem:[#allocation5 + $0x1d4] sm:$0xf0]  ;;  %499 = vmatpush.bf16.msra.mxu1 %v900_v17  ;;  %v956_v34 = vor.u32 %v1148_v30, %v955_v28  ;;  %v1114_v36 = vld [vmem:[#allocation5 + $0x44] sm:$0xf0] }
  0x1e   :  { %513 = vmatpush.bf16.msra.mxu2 %v964_v21  ;;  %v883_v37 = vld [vmem:[#allocation5 + $0xc0] sm:$0xf]  ;;  %v1020_v38 = vor.u32 %v1164_v32, %v1019_v31  ;;  %v1130_v39 = vld [vmem:[#allocation5 + $0xc4] sm:$0xf0]  ;;  %v820_v44 = vor.u32 %v1114_v36, %v819_v35  ;;  %v811_v47 = vld [vmem:[#allocation5 + $0x30] sm:$0xf] }
  0x1f   :  { %527 = vmatpush.bf16.msra.mxu3 %v1028_v25  ;;  %v947_v40 = vld [vmem:[#allocation5 + $0x140] sm:$0xf]  ;;  %v1146_v41 = vld [vmem:[#allocation5 + $0x144] sm:$0xf0]  ;;  %v884_v45 = vor.u32 %v1130_v39, %v883_v37  ;;  %v1112_v48 = vld [vmem:[#allocation5 + $0x34] sm:$0xf0] }
  0x20   :  { %v1011_v42 = vld [vmem:[#allocation5 + $0x1c0] sm:$0xf]  ;;  %v1162_v43 = vld [vmem:[#allocation5 + $0x1c4] sm:$0xf0]  ;;  %486 = vmatpush.bf16.msra.mxu0 %v828_v29  ;;  %v948_v46 = vor.u32 %v1146_v41, %v947_v40  ;;  %v875_v49 = vld [vmem:[#allocation5 + $0xb0] sm:$0xf]  ;;  %v812_v56 = vor.u32 %v1112_v48, %v811_v47 }
  0x21   :  { %500 = vmatpush.bf16.msra.mxu1 %v892_v33  ;;  %v1012_v50 = vor.u32 %v1162_v43, %v1011_v42  ;;  %v1128_v51 = vld [vmem:[#allocation5 + $0xb4] sm:$0xf0]  ;;  %v939_v52 = vld [vmem:[#allocation5 + $0x130] sm:$0xf]  ;;  %v803_v59 = vld [vmem:[#allocation5 + $0x20] sm:$0xf] }
  0x22   :  { %514 = vmatpush.bf16.msra.mxu2 %v956_v34  ;;  %v1144_v53 = vld [vmem:[#allocation5 + $0x134] sm:$0xf0]  ;;  %v1003_v54 = vld [vmem:[#allocation5 + $0x1b0] sm:$0xf]  ;;  %v876_v57 = vor.u32 %v1128_v51, %v875_v49  ;;  %v1110_v60 = vld [vmem:[#allocation5 + $0x24] sm:$0xf0] }
  0x23   :  { %528 = vmatpush.bf16.msra.mxu3 %v1020_v38  ;;  %v1160_v55 = vld [vmem:[#allocation5 + $0x1b4] sm:$0xf0]  ;;  %v940_v58 = vor.u32 %v1144_v53, %v939_v52  ;;  %v867_v61 = vld [vmem:[#allocation5 + $0xa0] sm:$0xf]  ;;  %v1126_v63 = vld [vmem:[#allocation5 + $0xa4] sm:$0xf0]  ;;  %v804_v4 = vor.u32 %v1110_v60, %v803_v59 }
  0x24   :  { %487 = vmatpush.bf16.msra.mxu0 %v820_v44  ;;  %v1004_v62 = vor.u32 %v1160_v55, %v1003_v54  ;;  %v931_v0 = vld [vmem:[#allocation5 + $0x120] sm:$0xf]  ;;  %v1142_v1 = vld [vmem:[#allocation5 + $0x124] sm:$0xf0]  ;;  %v795_v5 = vld [vmem:[#allocation5 + $0x10] sm:$0xf]  ;;  %v868_v6 = vor.u32 %v1126_v63, %v867_v61 }
  0x25   :  { %501 = vmatpush.bf16.msra.mxu1 %v884_v45  ;;  %v995_v2 = vld [vmem:[#allocation5 + $0x1a0] sm:$0xf]  ;;  %v1158_v3 = vld [vmem:[#allocation5 + $0x1a4] sm:$0xf0]  ;;  %v932_v7 = vor.u32 %v1142_v1, %v931_v0  ;;  %v1108_v8 = vld [vmem:[#allocation5 + $0x14] sm:$0xf0] }
  0x26   :  { %515 = vmatpush.bf16.msra.mxu2 %v948_v46  ;;  %v859_v9 = vld [vmem:[#allocation5 + $0x90] sm:$0xf]  ;;  %v1124_v10 = vld [vmem:[#allocation5 + $0x94] sm:$0xf0]  ;;  %v996_v11 = vor.u32 %v1158_v3, %v995_v2  ;;  %v787_v16 = vld [vmem:[#allocation5] sm:$0xf]  ;;  %v796_v18 = vor.u32 %v1108_v8, %v795_v5 }
  0x27   :  { %529 = vmatpush.bf16.msra.mxu3 %v1012_v50  ;;  %v923_v12 = vld [vmem:[#allocation5 + $0x110] sm:$0xf]  ;;  %v1140_v13 = vld [vmem:[#allocation5 + $0x114] sm:$0xf0]  ;;  %v1106_v17 = vld [vmem:[#allocation5 + $0x4] sm:$0xf0]  ;;  %v860_v23 = vor.u32 %v1124_v10, %v859_v9 }
  0x28   :  { %488 = vmatpush.bf16.msra.mxu0 %v812_v56  ;;  %v987_v14 = vld [vmem:[#allocation5 + $0x190] sm:$0xf]  ;;  %v1156_v15 = vld [vmem:[#allocation5 + $0x194] sm:$0xf0]  ;;  %v851_v19 = vld [vmem:[#allocation5 + $0x80] sm:$0xf]  ;;  %v924_v24 = vor.u32 %v1140_v13, %v923_v12  ;;  %v788_v35 = vor.u32 %v1106_v17, %v787_v16 }
  0x29   :  { %502 = vmatpush.bf16.msra.mxu1 %v876_v57  ;;  %v1122_v20 = vld [vmem:[#allocation5 + $0x84] sm:$0xf0]  ;;  %v915_v21 = vld [vmem:[#allocation5 + $0x100] sm:$0xf]  ;;  %v1119_v27 = vld [vmem:[#allocation5 + $0x74] sm:$0xf]  ;;  %v988_v28 = vor.u32 %v1156_v15, %v987_v14 }
  0x2a   :  { %516 = vmatpush.bf16.msra.mxu2 %v940_v58  ;;  %v1138_v22 = vld [vmem:[#allocation5 + $0x104] sm:$0xf0]  ;;  %v979_v25 = vld [vmem:[#allocation5 + $0x180] sm:$0xf]  ;;  %v845_v29 = vld [vmem:[#allocation5 + $0x78] sm:$0xf0]  ;;  %v852_v39 = vor.u32 %v1122_v20, %v851_v19 }
  0x2b   :  { %530 = vmatpush.bf16.msra.mxu3 %v1004_v62  ;;  %v1154_v26 = vld [vmem:[#allocation5 + $0x184] sm:$0xf0]  ;;  %v1135_v30 = vld [vmem:[#allocation5 + $0xf4] sm:$0xf]  ;;  %v909_v31 = vld [vmem:[#allocation5 + $0xf8] sm:$0xf0]  ;;  %v916_v40 = vor.u32 %v1138_v22, %v915_v21  ;;  %v848_v45 = vor.u32 %v1119_v27, %v845_v29 }
  0x2c   :  { %489 = vmatpush.bf16.msra.mxu0 %v804_v4  ;;  %v1151_v32 = vld [vmem:[#allocation5 + $0x174] sm:$0xf]  ;;  %v973_v33 = vld [vmem:[#allocation5 + $0x178] sm:$0xf0]  ;;  %v82_v41 = vld [vmem:[#allocation2] sm:$0xff]  ;;  %v980_v44 = vor.u32 %v1154_v26, %v979_v25  ;;  %v912_v49 = vor.u32 %v1135_v30, %v909_v31  ;;  %s1335_s17 = smov [#allocation10]  }
  0x2d   :  { %503 = vmatpush.bf16.msra.mxu1 %v868_v6  ;;  %v1167_v34 = vld [vmem:[#allocation5 + $0x1f4] sm:$0xf]  ;;  %v1037_v36 = vld [vmem:[#allocation5 + $0x1f8] sm:$0xf0]  ;;  %v86_v42 = vld [vmem:[#allocation2 + $0x20] sm:$0xff]  ;;  %v976_v50 = vor.u32 %v1151_v32, %v973_v33  ;;  %s768_s18 = sshll.u32 %s1335_s17, 4  ;;  %s769_s18 = int_to_ptr.vmem [resolvable:$true] %s768_s18 }
  0x2e   :  { %517 = vmatpush.bf16.msra.mxu2 %v932_v7  ;;  %v84_v37 = vld [vmem:[#allocation2 + $0x10] sm:$0xff]  ;;  %v85_v43 = vld [vmem:[#allocation2 + $0x18] sm:$0xff]  ;;  %v1117_v47 = vld [vmem:[#allocation5 + $0x64] sm:$0xf]  ;;  %v1040_v54 = vor.u32 %v1167_v34, %v1037_v36  ;;  %v1383_v59 = vpack.c.bf16 %v86_v42, %v82_v41  ;;  %s770_s21 = sshll.u32 %s1411_s5, 4  ;;  %s771_s21 = int_to_ptr.hbm [resolvable:$true] %s770_s21 }
  0x2f   :  { %531 = vmatpush.bf16.msra.mxu3 %v996_v11  ;;  %v88_v38 = vld [vmem:[#allocation2 + $0x30] sm:$0xff]  ;;  %v89_v46 = vld [vmem:[#allocation2 + $0x38] sm:$0xff]  ;;  %v837_v48 = vld [vmem:[#allocation5 + $0x68] sm:$0xf0] }
  0x30   :  { %490 = vmatpush.bf16.msra.mxu0 %v796_v18  ;;  %v1133_v51 = vld [vmem:[#allocation5 + $0xe4] sm:$0xf]  ;;  %v83_v52 = vld [vmem:[#allocation2 + $0x8] sm:$0xff]  ;;  %v1381_v55 = vpack.c.bf16 %v88_v38, %v84_v37  ;;  %v1385_v60 = vpack.c.bf16 %v89_v46, %v85_v43  ;;  %v840_v63 = vor.u32 %v1117_v47, %v837_v48  ;;  %v1115_v3 = vld [vmem:[#allocation5 + $0x54] sm:$0xf] }
  0x31   :  { %504 = vmatpush.bf16.msra.mxu1 %v860_v23  ;;  %v87_v53 = vld [vmem:[#allocation2 + $0x28] sm:$0xff]  ;;  %v1149_v57 = vld [vmem:[#allocation5 + $0x164] sm:$0xf]  ;;  %v829_v4 = vld [vmem:[#allocation5 + $0x58] sm:$0xf0] }
  0x32   :  { %518 = vmatpush.bf16.msra.mxu2 %v924_v24  ;;  %v901_v56 = vld [vmem:[#allocation5 + $0xe8] sm:$0xf0]  ;;  %v1165_v61 = vld [vmem:[#allocation5 + $0x1e4] sm:$0xf]  ;;  %v1387_v0 = vpack.c.bf16 %v87_v53, %v83_v52  ;;  %v1131_v5 = vld [vmem:[#allocation5 + $0xd4] sm:$0xf]  ;;  %v832_v12 = vor.u32 %v1115_v3, %v829_v4 }
  0x33   :  { %532 = vmatpush.bf16.msra.mxu3 %v988_v28  ;;  %v965_v58 = vld [vmem:[#allocation5 + $0x168] sm:$0xf0]  ;;  %v904_v1 = vor.u32 %v1133_v51, %v901_v56  ;;  %v893_v7 = vld [vmem:[#allocation5 + $0xd8] sm:$0xf0]  ;;  %v1147_v8 = vld [vmem:[#allocation5 + $0x154] sm:$0xf] }
  0x34   :  { %491 = vmatpush.bf16.msra.mxu0 %v788_v35  ;;  %v1029_v62 = vld [vmem:[#allocation5 + $0x1e8] sm:$0xf0]  ;;  %v968_v2 = vor.u32 %v1149_v57, %v965_v58  ;;  %v957_v9 = vld [vmem:[#allocation5 + $0x158] sm:$0xf0]  ;;  %v1163_v10 = vld [vmem:[#allocation5 + $0x1d4] sm:$0xf]  ;;  %v896_v13 = vor.u32 %v1131_v5, %v893_v7 }
  0x35   :  { %505 = vmatpush.bf16.msra.mxu1 %v852_v39  ;;  %v1032_v6 = vor.u32 %v1165_v61, %v1029_v62  ;;  %v1021_v11 = vld [vmem:[#allocation5 + $0x1d8] sm:$0xf0]  ;;  %v960_v14 = vor.u32 %v1147_v8, %v957_v9  ;;  %v1113_v15 = vld [vmem:[#allocation5 + $0x44] sm:$0xf]  ;;  %v821_v16 = vld [vmem:[#allocation5 + $0x48] sm:$0xf0] }
  0x36   :  { %519 = vmatpush.bf16.msra.mxu2 %v916_v40  ;;  %v1129_v17 = vld [vmem:[#allocation5 + $0xc4] sm:$0xf]  ;;  %v1024_v18 = vor.u32 %v1163_v10, %v1021_v11  ;;  %v885_v19 = vld [vmem:[#allocation5 + $0xc8] sm:$0xf0]  ;;  %v824_v24 = vor.u32 %v1113_v15, %v821_v16  ;;  %v1111_v27 = vld [vmem:[#allocation5 + $0x34] sm:$0xf] }
  0x37   :  { %533 = vmatpush.bf16.msra.mxu3 %v980_v44  ;;  %492 = vmatmul.bf16.vlgmr.msra.gmra.mxu0 %v1383_v59  ;;  %v1145_v20 = vld [vmem:[#allocation5 + $0x144] sm:$0xf]  ;;  %v949_v21 = vld [vmem:[#allocation5 + $0x148] sm:$0xf0]  ;;  %v888_v25 = vor.u32 %v1129_v17, %v885_v19  ;;  %v813_v28 = vld [vmem:[#allocation5 + $0x38] sm:$0xf0] }
  0x38   :  { %540 = vmatpush.bf16.msrb.mxu0 %v848_v45  ;;  %506 = vmatmul.bf16.vlgmr.msra.gmra.mxu1 %v1387_v0  ;;  %v1161_v22 = vld [vmem:[#allocation5 + $0x1c4] sm:$0xf]  ;;  %v1013_v23 = vld [vmem:[#allocation5 + $0x1c8] sm:$0xf0]  ;;  %v952_v26 = vor.u32 %v1145_v20, %v949_v21  ;;  %v1127_v29 = vld [vmem:[#allocation5 + $0xb4] sm:$0xf]  ;;  %v816_v36 = vor.u32 %v1111_v27, %v813_v28 }
  0x39   :  { %554 = vmatpush.bf16.msrb.mxu1 %v912_v49  ;;  %520 = vmatmul.bf16.vlgmr.msra.gmra.mxu2 %v1381_v55  ;;  %v1016_v30 = vor.u32 %v1161_v22, %v1013_v23  ;;  %v877_v31 = vld [vmem:[#allocation5 + $0xb8] sm:$0xf0]  ;;  %v1143_v32 = vld [vmem:[#allocation5 + $0x134] sm:$0xf]  ;;  %v1109_v37 = vld [vmem:[#allocation5 + $0x24] sm:$0xf] }
  0x3a   :  { %568 = vmatpush.bf16.msrb.mxu2 %v976_v50  ;;  %534 = vmatmul.bf16.vlgmr.msra.gmra.mxu3 %v1385_v60  ;;  %v941_v33 = vld [vmem:[#allocation5 + $0x138] sm:$0xf0]  ;;  %v1159_v34 = vld [vmem:[#allocation5 + $0x1b4] sm:$0xf]  ;;  %v880_v38 = vor.u32 %v1127_v29, %v877_v31  ;;  %v805_v40 = vld [vmem:[#allocation5 + $0x28] sm:$0xf0] }
  0x3b   :  { %582 = vmatpush.bf16.msrb.mxu3 %v1040_v54  ;;  %v1005_v35 = vld [vmem:[#allocation5 + $0x1b8] sm:$0xf0]  ;;  %v944_v39 = vor.u32 %v1143_v32, %v941_v33  ;;  %v1125_v41 = vld [vmem:[#allocation5 + $0xa4] sm:$0xf]  ;;  %v869_v43 = vld [vmem:[#allocation5 + $0xa8] sm:$0xf0]  ;;  %v808_v48 = vor.u32 %v1109_v37, %v805_v40 }
  0x3c   :  { %541 = vmatpush.bf16.msrb.mxu0 %v840_v63  ;;  %v1008_v42 = vor.u32 %v1159_v34, %v1005_v35  ;;  %v1141_v44 = vld [vmem:[#allocation5 + $0x124] sm:$0xf]  ;;  %v933_v45 = vld [vmem:[#allocation5 + $0x128] sm:$0xf0]  ;;  %v872_v49 = vor.u32 %v1125_v41, %v869_v43  ;;  %v1107_v51 = vld [vmem:[#allocation5 + $0x14] sm:$0xf] }
  0x3d   :  { %555 = vmatpush.bf16.msrb.mxu1 %v904_v1  ;;  %v1157_v46 = vld [vmem:[#allocation5 + $0x1a4] sm:$0xf]  ;;  %v997_v47 = vld [vmem:[#allocation5 + $0x1a8] sm:$0xf0]  ;;  %v936_v50 = vor.u32 %v1141_v44, %v933_v45  ;;  %v797_v52 = vld [vmem:[#allocation5 + $0x18] sm:$0xf0] }
  0x3e   :  { %569 = vmatpush.bf16.msrb.mxu2 %v968_v2  ;;  %v1123_v53 = vld [vmem:[#allocation5 + $0x94] sm:$0xf]  ;;  %v1000_v54 = vor.u32 %v1157_v46, %v997_v47  ;;  %v861_v56 = vld [vmem:[#allocation5 + $0x98] sm:$0xf0]  ;;  %v800_v63 = vor.u32 %v1107_v51, %v797_v52  ;;  %v1105_v3 = vld [vmem:[#allocation5 + $0x4] sm:$0xf] }
  0x3f   :  { %583 = vmatpush.bf16.msrb.mxu3 %v1032_v6  ;;  %v1139_v57 = vld [vmem:[#allocation5 + $0x114] sm:$0xf]  ;;  %v925_v58 = vld [vmem:[#allocation5 + $0x118] sm:$0xf0]  ;;  %v864_v1 = vor.u32 %v1123_v53, %v861_v56  ;;  %v789_v4 = vld [vmem:[#allocation5 + $0x8] sm:$0xf0] }
  0x40   :  { %542 = vmatpush.bf16.msrb.mxu0 %v832_v12  ;;  %v1155_v61 = vld [vmem:[#allocation5 + $0x194] sm:$0xf]  ;;  %v989_v62 = vld [vmem:[#allocation5 + $0x198] sm:$0xf0]  ;;  %v928_v2 = vor.u32 %v1139_v57, %v925_v58  ;;  %v1121_v5 = vld [vmem:[#allocation5 + $0x84] sm:$0xf]  ;;  %v792_v12 = vor.u32 %v1105_v3, %v789_v4 }
  0x41   :  { %556 = vmatpush.bf16.msrb.mxu1 %v896_v13  ;;  %v992_v6 = vor.u32 %v1155_v61, %v989_v62  ;;  %v853_v7 = vld [vmem:[#allocation5 + $0x88] sm:$0xf0]  ;;  %v1137_v8 = vld [vmem:[#allocation5 + $0x104] sm:$0xf]  ;;  %v1176_v16 = vld [vmem:[#allocation8 + $0x38] sm:$0xff] }
  0x42   :  { %570 = vmatpush.bf16.msrb.mxu2 %v960_v14  ;;  %v917_v9 = vld [vmem:[#allocation5 + $0x108] sm:$0xf0]  ;;  %v1153_v10 = vld [vmem:[#allocation5 + $0x184] sm:$0xf]  ;;  %v856_v13 = vor.u32 %v1121_v5, %v853_v7  ;;  %v1175_v17 = vld [vmem:[#allocation8 + $0x30] sm:$0xff] }
  0x43   :  { %584 = vmatpush.bf16.msrb.mxu3 %v1024_v18  ;;  %v981_v11 = vld [vmem:[#allocation5 + $0x188] sm:$0xf0]  ;;  %v920_v14 = vor.u32 %v1137_v8, %v917_v9  ;;  %v1173_v19 = vld [vmem:[#allocation8 + $0x20] sm:$0xff]  ;;  %v1172_v20 = vld [vmem:[#allocation8 + $0x18] sm:$0xff] }
  0x44   :  { %543 = vmatpush.bf16.msrb.mxu0 %v824_v24  ;;  %v984_v15 = vor.u32 %v1153_v10, %v981_v11  ;;  %v1174_v18 = vld [vmem:[#allocation8 + $0x28] sm:$0xff]  ;;  %v1171_v21 = vld [vmem:[#allocation8 + $0x10] sm:$0xff]  ;;  %v1169_v23 = vld [vmem:[#allocation8] sm:$0xff] }
  0x45   :  { %557 = vmatpush.bf16.msrb.mxu1 %v888_v25  ;;  %v1170_v22 = vld [vmem:[#allocation8 + $0x8] sm:$0xff]  ;;  %v1184_v24 = vld [vmem:[#allocation8 + $0x78] sm:$0xff]  ;;  %v1181_v25 = vld [vmem:[#allocation8 + $0x60] sm:$0xff] }
  0x46   :  { %571 = vmatpush.bf16.msrb.mxu2 %v952_v26  ;;  %v1179_v35 = vld [vmem:[#allocation8 + $0x50] sm:$0xff]  ;;  %v1178_v40 = vld [vmem:[#allocation8 + $0x48] sm:$0xff]  ;;  %v1177_v46 = vld [vmem:[#allocation8 + $0x40] sm:$0xff] }
  0x47   :  { %585 = vmatpush.bf16.msrb.mxu3 %v1016_v30  ;;  %v1180_v30 = vld [vmem:[#allocation8 + $0x58] sm:$0xff] }
  0x48   :  { %544 = vmatpush.bf16.msrb.mxu0 %v816_v36  ;;  %v1196_v10 = vld [vmem:[%s1410_s4] ss:$0 sm:$0xff] }
  0x49   :  { %558 = vmatpush.bf16.msrb.mxu1 %v880_v38 }
  0x4a   :  { %572 = vmatpush.bf16.msrb.mxu2 %v944_v39 }
  0x4b   :  { %586 = vmatpush.bf16.msrb.mxu3 %v1008_v42 }
  0x4c   :  { %545 = vmatpush.bf16.msrb.mxu0 %v808_v48 }
  0x4d   :  { %559 = vmatpush.bf16.msrb.mxu1 %v872_v49 }
  0x4e   :  { %573 = vmatpush.bf16.msrb.mxu2 %v936_v50 }
  0x4f   :  { %587 = vmatpush.bf16.msrb.mxu3 %v1000_v54 }
  0x50   :  { %546 = vmatpush.bf16.msrb.mxu0 %v800_v63 }
  0x51   :  { %560 = vmatpush.bf16.msrb.mxu1 %v864_v1 }
  0x52   :  { %574 = vmatpush.bf16.msrb.mxu2 %v928_v2 }
  0x53   :  { %588 = vmatpush.bf16.msrb.mxu3 %v992_v6 }
  0x54   :  { %547 = vmatpush.bf16.msrb.mxu0 %v792_v12 }
  0x55   :  { %561 = vmatpush.bf16.msrb.mxu1 %v856_v13 }
  0x56   :  { %575 = vmatpush.bf16.msrb.mxu2 %v920_v14 }
  0x57   :  { %589 = vmatpush.bf16.msrb.mxu3 %v984_v15  ;;  %548 = vmatmul.bf16.vlgmr.msrb.gmra.mxu0 %v1383_v59  ;;  %v1183_v59 = vld [vmem:[#allocation8 + $0x70] sm:$0xff] }
  0x58   :  { %734 = vmatpush.bf16.msra.mxu0 %v1176_v16  ;;  %562 = vmatmul.bf16.vlgmr.msrb.gmra.mxu1 %v1387_v0  ;;  %v158_v0 = vld [vmem:[#allocation7] sm:$0x3] }
  0x59   :  { %576 = vmatmul.bf16.vlgmr.msrb.gmra.mxu2 %v1381_v55  ;;  %748 = vmatpush.bf16.msra.mxu1 %v1184_v24  ;;  %v1182_v55 = vld [vmem:[#allocation8 + $0x68] sm:$0xff]  ;;  %v161_v49 = vperm.slane %v158_v0, 1 }
  0x5a   :  { %590 = vmatmul.bf16.vlgmr.msrb.gmra.mxu3 %v1385_v60  ;;  %v160_v60 = vperm.slane %v158_v0, 0 }
  0x5c   :  { %735 = vmatpush.bf16.msra.mxu0 %v1175_v17 }
  0x5d   :  { %749 = vmatpush.bf16.msra.mxu1 %v1183_v59 }
  0x60   :  { %736 = vmatpush.bf16.msra.mxu0 %v1174_v18 }
  0x61   :  { %750 = vmatpush.bf16.msra.mxu1 %v1182_v55 }
  0x64   :  { %737 = vmatpush.bf16.msra.mxu0 %v1173_v19 }
  0x65   :  { %751 = vmatpush.bf16.msra.mxu1 %v1181_v25 }
  0x68   :  { %738 = vmatpush.bf16.msra.mxu0 %v1172_v20 }
  0x69   :  { %752 = vmatpush.bf16.msra.mxu1 %v1180_v30 }
  0x6c   :  { %739 = vmatpush.bf16.msra.mxu0 %v1171_v21 }
  0x6d   :  { %753 = vmatpush.bf16.msra.mxu1 %v1179_v35 }
  0x70   :  { %740 = vmatpush.bf16.msra.mxu0 %v1170_v22 }
  0x71   :  { %754 = vmatpush.bf16.msra.mxu1 %v1178_v40 }
  0x74   :  { %741 = vmatpush.bf16.msra.mxu0 %v1169_v23 }
  0x75   :  { %755 = vmatpush.bf16.msra.mxu1 %v1177_v46 }
  0xb4   :  { %v493_v26 = vpop.f32.mrf.mxu0 }
  0xb5   :  { %v494_v27 = vadd.f32 %v493_v26, %v160_v60  ;;  %v507_v28 = vpop.f32.mrf.mxu1 }
  0xb7   :  { %v508_v29 = vadd.f32 %v507_v28, %v494_v27 }
  0xbc   :  { %v521_v31 = vpop.f32.mrf.mxu2  ;;  %v495_v34 = vpop.f32.mrf.mxu0 }
  0xbd   :  { %v535_v32 = vpop.f32.mrf.mxu3  ;;  %v522_v33 = vadd.f32 %v521_v31, %v508_v29  ;;  %v496_v36 = vadd.f32 %v495_v34, %v160_v60  ;;  %v509_v37 = vpop.f32.mrf.mxu1 }
  0xbf   :  { %v510_v38 = vadd.f32 %v509_v37, %v496_v36  ;;  %v536_v39 = vadd.f32 %v535_v32, %v522_v33 }
  0xc1   :  { %v596_v44 = vmax.f32 %v536_v39, 0.0 }
  0xc4   :  { %v523_v41 = vpop.f32.mrf.mxu2 }
  0xc5   :  { %v524_v42 = vadd.f32 %v523_v41, %v510_v38  ;;  %v537_v43 = vpop.f32.mrf.mxu3 }
  0xc7   :  { %v538_v45 = vadd.f32 %v537_v43, %v524_v42 }
  0xc9   :  { %v598_v47 = vmax.f32 %v538_v45, 0.0 }
  0xcb   :  { %v600_v48 = vpack.c.bf16 %v598_v47, %v596_v44 }
  0xcd   :  { %742 = vmatmul.bf16.vlgmr.msra.gmra.mxu0 %v600_v48 }
  0xd4   :  { %v549_v50 = vpop.f32.mrf.mxu0 }
  0xd5   :  { %v563_v51 = vpop.f32.mrf.mxu1  ;;  %v550_v52 = vadd.f32 %v549_v50, %v161_v49 }
  0xd7   :  { %v564_v54 = vadd.f32 %v563_v51, %v550_v52 }
  0xdc   :  { %v577_v53 = vpop.f32.mrf.mxu2  ;;  %v551_v57 = vpop.f32.mrf.mxu0 }
  0xdd   :  { %v591_v56 = vpop.f32.mrf.mxu3  ;;  %v552_v58 = vadd.f32 %v551_v57, %v161_v49  ;;  %v578_v61 = vadd.f32 %v577_v53, %v564_v54  ;;  %v565_v62 = vpop.f32.mrf.mxu1 }
  0xdf   :  { %v566_v63 = vadd.f32 %v565_v62, %v552_v58  ;;  %v592_v2 = vadd.f32 %v591_v56, %v578_v61 }
  0xe1   :  { %v597_v6 = vmax.f32 %v592_v2, 0.0 }
  0xe4   :  { %v579_v1 = vpop.f32.mrf.mxu2 }
  0xe5   :  { %v580_v3 = vadd.f32 %v579_v1, %v566_v63  ;;  %v593_v4 = vpop.f32.mrf.mxu3 }
  0xe7   :  { %v594_v5 = vadd.f32 %v593_v4, %v580_v3 }
  0xe9   :  { %v599_v7 = vmax.f32 %v594_v5, 0.0 }
  0xeb   :  { %v601_v8 = vpack.c.bf16 %v599_v7, %v597_v6 }
  0xed   :  { %756 = vmatmul.bf16.vlgmr.msra.gmra.mxu1 %v601_v8 }
 0x14a   :  { %v743_v9 = vpop.f32.mrf.mxu0 }
 0x14b   :  { %v744_v11 = vadd.f32 %v1196_v10, %v743_v9 }
 0x152   :  { %v745_v14 = vpop.f32.mrf.mxu0 }
 0x153   :  { %v746_v15 = vadd.f32 %v1196_v10, %v745_v14 }
 0x16a   :  { %v757_v12 = vpop.f32.mrf.mxu1 }
 0x16b   :  { %v758_v13 = vadd.f32 %v757_v12, %v744_v11 }
 0x16d   :  { %762 = vst [vmem:[#allocation10] sm:$0xff] %v758_v13 }
 0x172   :  { %v759_v16 = vpop.f32.mrf.mxu1 }
 0x173   :  { %v760_v17 = vadd.f32 %v759_v16, %v746_v15 }
 0x175   :  { %763 = vst [vmem:[#allocation10 + $0x8] sm:$0xff] %v760_v17 }
 0x176   :  { %776 = dma.vmem_to_hbm [thread:$0]  %s769_s18, 256, %s771_s21, [#allocation4], %s1326_s26, %s1326_s26, %s1327_s27  }
 0x177   :  { %1323 = dma.done.wait [#allocation4], 256  }
 0x178   :  { %1324 = vsyncadd [#allocation4], 4294967040 }
 0x179   :  { %781 = vsyncpa [#allocation3], 1 }
 0x17a   :  { %782 = vsyncpa [#allocation6], 1 }
 0x17b   :  { %783 = vsyncpa [#allocation9], 1 }
 0x17c   :  { %784 = vsyncpa [#allocation4], 1 }

</bundles_post_ra>
